<compile_context>
chip_gen: v7x
topology: tpu7x:2x2x1
jax: 0.10.0
libtpu: 0.0.40
codegen_flags: <defaults>
</compile_context>

<pallas_src>
import functools

import jax
import jax.numpy as jnp
from jax import lax
from jax.experimental import pallas as pl
from jax.experimental.pallas import tpu as pltpu

EPS = 1e-5
LANE = 128  # lane alignment; 256 would better fill the v6e/v7x MXU when
            # compute-bound, but typical GCN widths are HBM-bound, so the
            # smaller padding wins.


def _round_up(v, m):
    return (v + m - 1) // m * m


def _round_down(v, m):
    return v // m * m


def _vmem_capacity_bytes():
    try:
        return int(pltpu.get_tpu_info().vmem_capacity_bytes)
    except Exception:
        return 64 * 1024 * 1024  # v7x per-TC capacity: safe lower bound


# --------------------------------------------------------------------------- #
# Kernels
# --------------------------------------------------------------------------- #
def _accumulate_stats(y, stats_ref, *, t_rows, n_rows):
    """Per-tile BN statistics from the f32 matmul accumulator.

    Stores [masked row sum, sum of squares about the *tile* mean]; the tail
    row tile (rows >= n_rows) is masked out so garbage rows never contribute.
    Row-grid axis is axis 1 of the (dout_blocks, row_tiles) grid.
    """
    row_start = pl.program_id(1) * t_rows
    rows = lax.broadcasted_iota(jnp.int32, y.shape, 0) + row_start
    mask = rows < n_rows
    cnt = jnp.minimum(t_rows, n_rows - row_start).astype(jnp.float32)

    y_m = jnp.where(mask, y, 0.0)
    s = jnp.sum(y_m, axis=0, keepdims=True)                    # (1, t_dout)
    tile_mean = s / cnt
    centered = jnp.where(mask, y - tile_mean, 0.0)
    m2 = jnp.sum(centered * centered, axis=0, keepdims=True)   # (1, t_dout)

    stats_ref[:, 0, :] = s
    stats_ref[:, 1, :] = m2


def _stats_only_kernel(x_ref, w_ref, stats_ref, *, t_rows, n_rows):
    # Recompute path, phase 1: y never leaves VMEM.
    y = jnp.dot(x_ref[...], w_ref[...], preferred_element_type=jnp.float32)
    _accumulate_stats(y, stats_ref, t_rows=t_rows, n_rows=n_rows)


def _linear_stats_store_kernel(x_ref, w_ref, y_ref, stats_ref, *, t_rows, n_rows):
    # Materialize path, phase 1: stats from f32, y stored as bf16 (half traffic).
    y = jnp.dot(x_ref[...], w_ref[...], preferred_element_type=jnp.float32)
    y_ref[...] = y.astype(y_ref.dtype)
    _accumulate_stats(y, stats_ref, t_rows=t_rows, n_rows=n_rows)


def _linear_norm_act_kernel(x_ref, w_ref, scale_ref, shift_ref, o_ref):
    # Recompute path, phase 2: fused matmul + folded BN + ReLU.
    y = jnp.dot(x_ref[...], w_ref[...], preferred_element_type=jnp.float32)
    o_ref[...] = jnp.maximum(y * scale_ref[...] + shift_ref[...], 0.0
                             ).astype(o_ref.dtype)


def _norm_act_kernel(y_ref, scale_ref, shift_ref, o_ref):
    # Materialize path, phase 2: folded BN + ReLU on the bf16 intermediate.
    y = y_ref[...].astype(jnp.float32)
    o_ref[...] = jnp.maximum(y * scale_ref[...] + shift_ref[...], 0.0
                             ).astype(o_ref.dtype)


# --------------------------------------------------------------------------- #
# Wrapper
# --------------------------------------------------------------------------- #
def gcn_layer(x, weight, bias, gamma, beta, *, activation="relu",
              batch_norm=True, y_dtype=jnp.bfloat16):
    """Pallas TPU forward of GraphConvolutionNetworkLayer.

    x: (B, N, D_in); weight: (D_out, D_in) (PyTorch nn.Linear layout);
    bias/gamma/beta: (D_out,).  Returns (B, N, D_out) float32.
    Forward = Linear -> BatchNorm1d (training-mode batch stats) -> ReLU.
    """
    if (not batch_norm) or activation != "relu":
        # TODO(synk): only the batch_norm=True / activation='relu' config is
        # implemented (the bias-drop below is only valid under train-mode BN).
        raise NotImplementedError(
            "gcn_layer implements batch_norm=True with activation='relu' only")

    B, N, Din = x.shape
    Dout, Din_w = weight.shape
    assert Din_w == Din
    n_rows = B * N

    # The Linear bias only shifts the per-feature mean; train-mode BN removes
    # it exactly, so it never reaches the kernel.
    del bias

    Din_p = _round_up(Din, LANE)
    Dout_p = _round_up(Dout, LANE)

    # Feature-dim zero padding (needed for lane alignment & exact matmul);
    # there is NO row padding and NO final row slice.
    x_flat = x.reshape(n_rows, Din).astype(jnp.float32)
    if Din_p != Din:
        x_flat = jnp.pad(x_flat, ((0, 0), (0, Din_p - Din)))
    # One-time wrapper transpose: (Din_p, Dout_p) so the in-kernel dot
    # contracts natural dims (no per-grid-step weight transpose).
    w_t = weight.astype(jnp.float32).T
    if (Din_p, Dout_p) != (Din, Dout):
        w_t = jnp.pad(w_t, ((0, Din_p - Din), (0, Dout_p - Dout)))
    gamma_p = jnp.pad(gamma.astype(jnp.float32), (0, Dout_p - Dout),
                      constant_values=1.0)
    beta_p = jnp.pad(beta.astype(jnp.float32), (0, Dout_p - Dout))

    # ---- VMEM-aware tiling -------------------------------------------------
    vmem_cap = _vmem_capacity_bytes()
    budget = int(vmem_cap * 0.55)          # operand budget (double-buffered)
    vmem_limit = int(vmem_cap * 0.90)      # explicit scoped limit

    # Recompute path whenever y is at least as large as x.
    recompute = Dout_p >= Din_p

    # Dout tiling escape hatch: keep the (double-buffered) weight block under
    # half the budget.
    w_col_bytes = 2 * Din_p * 4
    t_dout = min(Dout_p,
                 max(LANE, _round_down((budget // 2) // w_col_bytes, LANE)))
    num_dt = pl.cdiv(Dout_p, t_dout)
    # TODO(synk): for extremely large D_in a K-tiled grid with a VMEM f32
    # accumulator would be needed; not implemented.

    # Row tile for the matmul phases (double-buffered x + output block).
    per_row = 2 * Din_p * 4 + 2 * t_dout * (4 if recompute else 2)
    avail = max(budget - 2 * Din_p * t_dout * 4, per_row * 8)
    t_rows = max(8, min(1024, _round_down(avail // per_row, 8)))
    if t_rows >= n_rows:
        t_rows = n_rows                     # single full-extent row block
    num_rt = pl.cdiv(n_rows, t_rows)

    grid = (num_dt, num_rt)                 # dout blocks outer, row tiles inner
    x_spec = pl.BlockSpec((t_rows, Din_p), lambda j, i: (i, 0))
    w_spec = pl.BlockSpec((Din_p, t_dout), lambda j, i: (0, j))
    y_spec = pl.BlockSpec((t_rows, t_dout), lambda j, i: (i, j))
    sc_spec = pl.BlockSpec((1, t_dout), lambda j, i: (0, j))
    stats_spec = pl.BlockSpec((1, 2, t_dout), lambda j, i: (i, 0, j))
    stats_shape = jax.ShapeDtypeStruct((num_rt, 2, Dout_p), jnp.float32)

    mm_params = pltpu.CompilerParams(
        dimension_semantics=("parallel", "parallel"),
        vmem_limit_bytes=vmem_limit)
    mm_cost = pl.CostEstimate(
        flops=2 * n_rows * Din_p * Dout_p,
        transcendentals=0,
        bytes_accessed=4 * (num_dt * n_rows * Din_p + Din_p * Dout_p
                            + n_rows * Dout_p))

    # ---- Phase 1: matmul (+ optional bf16 y) + per-tile partial stats -------
    if recompute:
        stats = pl.pallas_call(
            functools.partial(_stats_only_kernel, t_rows=t_rows, n_rows=n_rows),
            out_shape=stats_shape,
            grid=grid,
            in_specs=[x_spec, w_spec],
            out_specs=stats_spec,
            compiler_params=mm_params,
            cost_estimate=mm_cost,
        )(x_flat, w_t)
        y_p = None
    else:
        y_p, stats = pl.pallas_call(
            functools.partial(_linear_stats_store_kernel,
                              t_rows=t_rows, n_rows=n_rows),
            out_shape=(jax.ShapeDtypeStruct((n_rows, Dout_p), y_dtype),
                       stats_shape),
            grid=grid,
            in_specs=[x_spec, w_spec],
            out_specs=(y_spec, stats_spec),
            compiler_params=mm_params,
            cost_estimate=mm_cost,
        )(x_flat, w_t)

    # ---- Tiny wrapper-side reduction + BN folding (all f32) -----------------
    counts = jnp.asarray([min(t_rows, n_rows - i * t_rows)
                          for i in range(num_rt)], jnp.float32)
    sums = stats[:, 0, :]                   # (num_rt, Dout_p)
    m2s = stats[:, 1, :]
    total = jnp.sum(sums, axis=0)
    mean = total / n_rows
    tile_mean = sums / counts[:, None]
    # Two-level (tile-shifted) variance: well conditioned even for |mean|>>std.
    m2 = (jnp.sum(m2s, axis=0)
          + jnp.sum(counts[:, None] * (tile_mean - mean) ** 2, axis=0))
    var = m2 / n_rows                       # biased variance, as BN uses
    inv_std = lax.rsqrt(var + EPS)
    scale = (gamma_p * inv_std).reshape(1, Dout_p)
    shift = (beta_p - mean * gamma_p * inv_std).reshape(1, Dout_p)

    # ---- Phase 2: (recomputed matmul +) folded BN + ReLU ---------------------
    if recompute:
        out_p = pl.pallas_call(
            _linear_norm_act_kernel,
            out_shape=jax.ShapeDtypeStruct((n_rows, Dout_p), jnp.float32),
            grid=grid,
            in_specs=[x_spec, w_spec, sc_spec, sc_spec],
            out_specs=y_spec,
            compiler_params=mm_params,
            cost_estimate=mm_cost,
        )(x_flat, w_t, scale, shift)
    else:
        # Pure elementwise pass: its own (larger) row tile, rows-only grid.
        y_bytes = jnp.dtype(y_dtype).itemsize
        per_row2 = 2 * Dout_p * (y_bytes + 4)
        t2 = max(8, min(2048, _round_down(budget // per_row2, 8)))
        if t2 >= n_rows:
            t2 = n_rows
        num_rt2 = pl.cdiv(n_rows, t2)
        # (input_output_aliases onto y_p would save footprint but needs a
        #  matching dtype; output stays f32 here.)
        out_p = pl.pallas_call(
            _norm_act_kernel,
            out_shape=jax.ShapeDtypeStruct((n_rows, Dout_p), jnp.float32),
            grid=(num_rt2,),
            in_specs=[pl.BlockSpec((t2, Dout_p), lambda i: (i, 0)),
                      pl.BlockSpec((1, Dout_p), lambda i: (0, 0)),
                      pl.BlockSpec((1, Dout_p), lambda i: (0, 0))],
            out_specs=pl.BlockSpec((t2, Dout_p), lambda i: (i, 0)),
            compiler_params=pltpu.CompilerParams(
                dimension_semantics=("parallel",),
                vmem_limit_bytes=vmem_limit),
            cost_estimate=pl.CostEstimate(
                flops=2 * n_rows * Dout_p, transcendentals=0,
                bytes_accessed=(y_bytes + 4) * n_rows * Dout_p),
        )(y_p, scale, shift)

    out = out_p if Dout_p == Dout else out_p[:, :Dout]
    return out.reshape(B, N, Dout)


# --------------------------------------------------------------------------- #
# Pure-JAX reference (matches the PyTorch forward, training-mode BN)
# --------------------------------------------------------------------------- #
def gcn_layer_ref(x, weight, bias, gamma, beta):
    B, N, _ = x.shape
    y = jnp.einsum("bnd,od->bno", x, weight) + bias
    Dout = y.shape[-1]
    y = y.reshape(B * N, Dout)
    mean = jnp.mean(y, axis=0, keepdims=True)
    var = jnp.mean((y - mean) ** 2, axis=0, keepdims=True)
    y = (y - mean) / jnp.sqrt(var + EPS)
    y = y * gamma + beta
    y = y.reshape(B, N, Dout)
    return jnp.maximum(y, 0.0)


if __name__ == "__main__":
    key = jax.random.PRNGKey(0)

    def init_linear(k, d_in, d_out):
        kw, kb = jax.random.split(k)
        bound = 1.0 / (d_in ** 0.5)
        w = jax.random.uniform(kw, (d_out, d_in), minval=-bound, maxval=bound,
                               dtype=jnp.float32)
        b = jax.random.uniform(kb, (d_out,), minval=-bound, maxval=bound,
                               dtype=jnp.float32)
        return w, b

    # Case 1: Dout_p >= Din_p -> fused recompute path (all-f32, no intermediate)
    B, N, Din, Dout = 2, 8, 32, 32
    k1, k2, key = jax.random.split(key, 3)
    x = jax.random.normal(k1, (B, N, Din), dtype=jnp.float32)
    w, b = init_linear(k2, Din, Dout)
    gamma = jnp.ones((Dout,), jnp.float32)
    beta = jnp.zeros((Dout,), jnp.float32)
    out = jax.block_until_ready(gcn_layer(x, w, b, gamma, beta))
    ref = gcn_layer_ref(x, w, b, gamma, beta)
    assert out.shape == (B, N, Dout)
    assert jnp.allclose(out, ref, atol=1e-3, rtol=1e-3), \
        float(jnp.max(jnp.abs(out - ref)))

    # Case 2: Din_p > Dout_p -> bf16-intermediate path + tail-row masking
    B, N, Din, Dout = 2, 10, 200, 64
    k1, k2, k3 = jax.random.split(key, 3)
    x = jax.random.normal(k1, (B, N, Din), dtype=jnp.float32) + 3.0
    w, b = init_linear(k2, Din, Dout)
    gamma = 1.0 + 0.1 * jax.random.normal(k3, (Dout,), dtype=jnp.float32)
    beta = 0.1 * jnp.ones((Dout,), jnp.float32)
    out = jax.block_until_ready(gcn_layer(x, w, b, gamma, beta))
    ref = gcn_layer_ref(x, w, b, gamma, beta)
    assert out.shape == (B, N, Dout)
    assert jnp.allclose(out, ref, atol=3e-2, rtol=3e-2), \
        float(jnp.max(jnp.abs(out - ref)))

    print("KERNEL_OK")
</pallas_src>

<mosaic_0001>
module attributes {stable_mosaic.version = 11 : i64} {
  func.func @_stats_only_kernel(%arg0: i32, %arg1: i32, %arg2: memref<16x128xf32, #tpu.memory_space<vmem>>, %arg3: memref<128x128xf32, #tpu.memory_space<vmem>>, %arg4: memref<1x2x128xf32, #tpu.memory_space<vmem>>) attributes {dimension_semantics = [#tpu.dimension_semantics<parallel>, #tpu.dimension_semantics<parallel>], iteration_bounds = array<i64: 1, 1>, scalar_prefetch = 0 : i64, scratch_operands = 0 : i64, tpu.core_type = #tpu.core_type<tc>, window_params = [{transform_indices = @transform_0, window_bounds = array<i64: 16, 128>}, {transform_indices = @transform_1, window_bounds = array<i64: 128, 128>}, {transform_indices = @transform_2, window_bounds = array<i64: 1, 2, 128>}]} {
    %c0 = arith.constant 0 : index
    %c0_0 = arith.constant 0 : index
    %0 = vector.load %arg2[%c0, %c0_0] : memref<16x128xf32, #tpu.memory_space<vmem>>, vector<16x128xf32>
    %c0_1 = arith.constant 0 : index
    %c0_2 = arith.constant 0 : index
    %1 = vector.load %arg3[%c0_1, %c0_2] : memref<128x128xf32, #tpu.memory_space<vmem>>, vector<128x128xf32>
    %cst = arith.constant dense<0.000000e+00> : vector<16x128xf32>
    %2 = tpu.matmul %0, %1, %cst {dimension_numbers = #tpu.dot_dimension_numbers<[1], [0], [0], [1], [0, 0, 1, 1], [], []>} : vector<16x128xf32>, vector<128x128xf32>, vector<16x128xf32> -> vector<16x128xf32>
    %c16_i32 = arith.constant 16 : i32
    %3 = arith.muli %arg1, %c16_i32 : i32
    %4 = tpu.iota {dimensions = array<i32: 0>} : vector<16x128xi32>
    %5 = vector.broadcast %3 : i32 to vector<16x128xi32>
    %6 = arith.addi %4, %5 : vector<16x128xi32>
    %c16_i32_3 = arith.constant 16 : i32
    %7 = vector.broadcast %c16_i32_3 : i32 to vector<16x128xi32>
    %8 = arith.cmpi slt, %6, %7 : vector<16x128xi32>
    %c16_i32_4 = arith.constant 16 : i32
    %9 = arith.subi %c16_i32_4, %3 : i32
    %c16_i32_5 = arith.constant 16 : i32
    %10 = arith.minsi %c16_i32_5, %9 : i32
    %11 = arith.sitofp %10 : i32 to f32
    %cst_6 = arith.constant 0.000000e+00 : f32
    %12 = vector.broadcast %cst_6 : f32 to vector<16x128xf32>
    %13 = arith.select %8, %2, %12 : vector<16x128xi1>, vector<16x128xf32>
    %cst_7 = arith.constant dense<0.000000e+00> : vector<128xf32>
    %14 = vector.multi_reduction <add>, %13, %cst_7 [0] : vector<16x128xf32> to vector<128xf32>
    %15 = vector.shape_cast %14 : vector<128xf32> to vector<1x128xf32>
    %16 = vector.broadcast %11 : f32 to vector<1x128xf32>
    %17 = arith.divf %15, %16 : vector<1x128xf32>
    %18 = vector.broadcast %17 : vector<1x128xf32> to vector<16x128xf32>
    %19 = arith.subf %2, %18 : vector<16x128xf32>
    %cst_8 = arith.constant 0.000000e+00 : f32
    %20 = vector.broadcast %cst_8 : f32 to vector<16x128xf32>
    %21 = arith.select %8, %19, %20 : vector<16x128xi1>, vector<16x128xf32>
    %22 = arith.mulf %21, %21 : vector<16x128xf32>
    %cst_9 = arith.constant dense<0.000000e+00> : vector<128xf32>
    %23 = vector.multi_reduction <add>, %22, %cst_9 [0] : vector<16x128xf32> to vector<128xf32>
    %24 = vector.shape_cast %23 : vector<128xf32> to vector<1x128xf32>
    %c0_10 = arith.constant 0 : index
    %c0_11 = arith.constant 0 : index
    %c0_12 = arith.constant 0 : index
    %25 = vector.load %arg4[%c0_10, %c0_11, %c0_12] : memref<1x2x128xf32, #tpu.memory_space<vmem>>, vector<1x1x128xf32>
    %26 = vector.shape_cast %25 : vector<1x1x128xf32> to vector<1x128xf32>
    %27 = vector.shape_cast %15 : vector<1x128xf32> to vector<1x1x128xf32>
    tpu.vector_store %arg4[%c0_10, %c0_11, %c0_12], %27 {strides = array<i32>} : memref<1x2x128xf32, #tpu.memory_space<vmem>>, vector<1x1x128xf32>,
    %c0_13 = arith.constant 0 : index
    %c1 = arith.constant 1 : index
    %c0_14 = arith.constant 0 : index
    %28 = vector.load %arg4[%c0_13, %c1, %c0_14] : memref<1x2x128xf32, #tpu.memory_space<vmem>>, vector<1x1x128xf32>
    %29 = vector.shape_cast %28 : vector<1x1x128xf32> to vector<1x128xf32>
    %30 = vector.shape_cast %24 : vector<1x128xf32> to vector<1x1x128xf32>
    tpu.vector_store %arg4[%c0_13, %c1, %c0_14], %30 {strides = array<i32>} : memref<1x2x128xf32, #tpu.memory_space<vmem>>, vector<1x1x128xf32>,
    return
  }
  func.func @transform_0(%arg0: i32, %arg1: i32) -> (i32, i32) {
    %c0_i32 = arith.constant 0 : i32
    %c0_i32_0 = arith.constant 0 : i32
    return %arg1, %c0_i32 : i32, i32
  }
  func.func @transform_1(%arg0: i32, %arg1: i32) -> (i32, i32) {
    %c0_i32 = arith.constant 0 : i32
    %c0_i32_0 = arith.constant 0 : i32
    return %c0_i32, %arg0 : i32, i32
  }
  func.func @transform_2(%arg0: i32, %arg1: i32) -> (i32, i32, i32) {
    %c0_i32 = arith.constant 0 : i32
    %c0_i32_0 = arith.constant 0 : i32
    return %arg1, %c0_i32, %arg0 : i32, i32, i32
  }
}

</mosaic_0001>

<bundles_post_ra>
// kernel: tpu_custom_call.1
= control target key start
LH: loop header
LB: loop body
LE: loop exit
PB: predicated region body
PF: predicated region fallthrough
CT: control target
= control target key end

     0   :  { %7 = vsyncpa [#allocation3], 0  ;;  %s407_s0 = inlined_call_operand.hbm [shape: f32[16,128], index: 0, kind: input, shape index: {}]   ;;  %s408_s1 = inlined_call_operand.hbm [shape: f32[128,128], index: 1, kind: input, shape index: {}]   ;;  %s409_s2 = inlined_call_operand.hbm [shape: f32[1,2,128], index: 2, kind: output, shape index: {}]  }
   0x1   :  { %8 = vsyncpa [#allocation6], 0 }
   0x2   :  { %9 = vsyncpa [#allocation4], 0  ;;  %s351_s9 = smov [#allocation2]   ;;  %s279_s13 = scalar_lea.hbm %s407_s0, 256 }
   0x3   :  { %s15_s10 = sshll.u32 %s351_s9, 4  ;;  %p280_p0 = scmp.ne.s32.totalorder %s407_s0, %s279_s13  ;;  %s16_s10 = int_to_ptr.vmem [resolvable:$true] %s15_s10 }
   0x4   :  { %p283_p1 = scmp.lt.u32.totalorder %s279_s13, %s407_s0 }
   0x6   :  { %p285_p2 = pnand %p283_p1, %p280_p0 }
   0x8   :  { %288 = shalt.err (!%p285_p2)
}
   0x9   :  { %s289_s18 = scalar_lea.vmem %s16_s10, 256  ;;  %p294_p4 = scmp.lt.s32.totalorder %s16_s10, %s16_s10 }
   0xa   :  { %p290_p3 = scmp.ne.s32.totalorder %s16_s10, %s289_s18  ;;  %p295_p5 = scmp.lt.s32.totalorder %s289_s18, %s289_s18 }
   0xc   :  { %p296_p6 = por %p295_p5, %p294_p4 }
   0xe   :  { %p297_p7 = pnand %p296_p6, %p290_p3 }
  0x10   :  { %300 = shalt.err (!%p297_p7)
}
  0x11   :  { %s352_s19 = smov 128   ;;  %s353_s20 = smov 8  }
  0x12   :  { %21 = dma.hbm_to_vmem [thread:$0]  %s407_s0, 256, %s16_s10, [#allocation3], %s352_s19, %s352_s19, %s353_s20  }
  0x13   :  { %s354_s23 = smov [#allocation5]   ;;  %s301_s27 = scalar_lea.hbm %s408_s1, 2048 }
  0x14   :  { %s27_s24 = sshll.u32 %s354_s23, 4  ;;  %p302_p8 = scmp.ne.s32.totalorder %s408_s1, %s301_s27  ;;  %s28_s24 = int_to_ptr.vmem [resolvable:$true] %s27_s24 }
  0x15   :  { %p305_p9 = scmp.lt.u32.totalorder %s301_s27, %s408_s1 }
  0x17   :  { %p307_p10 = pnand %p305_p9, %p302_p8 }
  0x19   :  { %310 = shalt.err (!%p307_p10)
}
  0x1a   :  { %s311_s4 = scalar_lea.vmem %s28_s24, 2048  ;;  %p316_p12 = scmp.lt.s32.totalorder %s28_s24, %s28_s24 }
  0x1b   :  { %p312_p11 = scmp.ne.s32.totalorder %s28_s24, %s311_s4  ;;  %p317_p13 = scmp.lt.s32.totalorder %s311_s4, %s311_s4 }
  0x1d   :  { %p318_p0 = por %p317_p13, %p316_p12 }
  0x1f   :  { %p319_p1 = pnand %p318_p0, %p312_p11 }
  0x21   :  { %322 = shalt.err (!%p319_p1)
}
  0x22   :  { %33 = dma.hbm_to_vmem [thread:$0]  %s408_s1, 2048, %s28_s24, [#allocation6], %s352_s19, %s352_s19, %s353_s20  }
  0x23   :  { %345 = dma.done.wait [#allocation3], 256  }
  0x24   :  { %346 = vsyncadd [#allocation3], 4294967040 }
  0x25   :  { %347 = dma.done.wait [#allocation6], 2048  }
  0x26   :  { %348 = vsyncadd [#allocation6], 4294965248  ;;  %v42_v0 = vld [vmem:[#allocation5] sm:$0xff]  ;;  %v43_v1 = vld [vmem:[#allocation5 + $0x8] sm:$0xff]  ;;  %s355_s1 = smov [#allocation7]  }
  0x27   :  { %v44_v2 = vld [vmem:[#allocation5 + $0x10] sm:$0xff]  ;;  %v242_v3 = vpack.c.bf16 %v43_v1, %v42_v0  ;;  %v45_v4 = vld [vmem:[#allocation5 + $0x18] sm:$0xff]  ;;  %v46_v6 = vld [vmem:[#allocation5 + $0x20] sm:$0xff]  ;;  %s179_s6 = sshll.u32 %s355_s1, 4  ;;  %s180_s6 = int_to_ptr.vmem [resolvable:$true] %s179_s6 }
  0x28   :  { %v246_v5 = vpack.c.bf16 %v45_v4, %v44_v2  ;;  %v47_v7 = vld [vmem:[#allocation5 + $0x28] sm:$0xff]  ;;  %v40_v9 = vld [vmem:[#allocation2] sm:$0xff]  ;;  %v49_v11 = vld [vmem:[#allocation5 + $0x38] sm:$0xff]  ;;  %s323_s7 = scalar_lea.vmem %s180_s6, 32  ;;  %p328_p3 = scmp.lt.s32.totalorder %s180_s6, %s180_s6 }
  0x29   :  { %243 = vmatprep.subr.bf16.mxu0 %v242_v3  ;;  %v250_v8 = vpack.c.bf16 %v47_v7, %v46_v6  ;;  %v48_v10 = vld [vmem:[#allocation5 + $0x30] sm:$0xff]  ;;  %239 = vmatprep.mubr.f32.mxu0 %v40_v9  ;;  %v50_v13 = vld [vmem:[#allocation5 + $0x40] sm:$0xff]  ;;  %v51_v14 = vld [vmem:[#allocation5 + $0x48] sm:$0xff]  ;;  %p324_p2 = scmp.ne.s32.totalorder %s180_s6, %s323_s7  ;;  %p329_p4 = scmp.lt.s32.totalorder %s323_s7, %s323_s7 }
  0x2a   :  { %245 = vmatpush3.bf16.msra.mxu0 %v242_v3  ;;  %v254_v12 = vpack.c.bf16 %v49_v11, %v48_v10  ;;  %v258_v15 = vpack.c.bf16 %v51_v14, %v50_v13  ;;  %v52_v16 = vld [vmem:[#allocation5 + $0x50] sm:$0xff]  ;;  %v53_v17 = vld [vmem:[#allocation5 + $0x58] sm:$0xff]  ;;  %v54_v19 = vld [vmem:[#allocation5 + $0x60] sm:$0xff] }
  0x2b   :  { %247 = vmatprep.subr.bf16.mxu0 %v246_v5  ;;  %v262_v18 = vpack.c.bf16 %v53_v17, %v52_v16  ;;  %v55_v20 = vld [vmem:[#allocation5 + $0x68] sm:$0xff]  ;;  %v56_v22 = vld [vmem:[#allocation5 + $0x70] sm:$0xff]  ;;  %v57_v23 = vld [vmem:[#allocation5 + $0x78] sm:$0xff]  ;;  %p330_p5 = por %p329_p4, %p328_p3 }
  0x2c   :  { %v266_v21 = vpack.c.bf16 %v55_v20, %v54_v19  ;;  %v270_v24 = vpack.c.bf16 %v57_v23, %v56_v22  ;;  %v41_v25 = vld [vmem:[#allocation2 + $0x8] sm:$0xff] }
  0x2d   :  { %p331_p6 = pnand %p330_p5, %p324_p2 }
  0x2e   :  { %249 = vmatpush3.bf16.msra.mxu0 %v246_v5 }
  0x2f   :  { %251 = vmatprep.subr.bf16.mxu0 %v250_v8 }
  0x32   :  { %253 = vmatpush3.bf16.msra.mxu0 %v250_v8 }
  0x33   :  { %255 = vmatprep.subr.bf16.mxu0 %v254_v12 }
  0x36   :  { %257 = vmatpush3.bf16.msra.mxu0 %v254_v12 }
  0x37   :  { %259 = vmatprep.subr.bf16.mxu0 %v258_v15 }
  0x3a   :  { %261 = vmatpush3.bf16.msra.mxu0 %v258_v15 }
  0x3b   :  { %263 = vmatprep.subr.bf16.mxu0 %v262_v18 }
  0x3e   :  { %265 = vmatpush3.bf16.msra.mxu0 %v262_v18 }
  0x3f   :  { %267 = vmatprep.subr.bf16.mxu0 %v266_v21 }
  0x42   :  { %269 = vmatpush3.bf16.msra.mxu0 %v266_v21 }
  0x43   :  { %271 = vmatprep.subr.bf16.mxu0 %v270_v24 }
  0x46   :  { %273 = vmatpush3.bf16.msra.mxu0 %v270_v24 }
  0x49   :  { %240 = vmatmul.mubr.f32.vlgmr.msra.gmra.mrb[0].mxu0 %v41_v25 }
 0x11c   :  { %v241_v26 = vpop.f32.mrb[0].mxu0 }
 0x11d   :  { %v124_v27 = vpop.f32.mrb[1].mxu0 }
 0x11e   :  { %v148_v28 = vadd.f32 %v241_v26, %v124_v27 }
 0x120   :  { %v149_v29 = vrot.slane %v148_v28, 4 }
 0x122   :  { %v150_v30 = vadd.f32 %v149_v29, %v148_v28 }
 0x124   :  { %v151_v31 = vrot.slane %v150_v30, 2 }
 0x126   :  { %v152_v32 = vadd.f32 %v151_v31, %v150_v30 }
 0x128   :  { %v153_v33 = vrot.slane %v152_v32, 1 }
 0x12a   :  { %v154_v34 = vadd.f32 %v153_v33, %v152_v32 }
 0x12c   :  { %v157_v35 = vmul.f32 0.0625, %v154_v34  ;;  %171 = vst [vmem:[#allocation7] sm:$0x1] %v154_v34 }
 0x12e   :  { %v158_v36 = vsub.f32 %v124_v27, %v157_v35  ;;  %v159_v37 = vsub.f32 %v241_v26, %v157_v35 }
 0x130   :  { %v162_v38 = vmul.f32 %v158_v36, %v158_v36  ;;  %v163_v39 = vmul.f32 %v159_v37, %v159_v37 }
 0x132   :  { %v164_v40 = vadd.f32 %v163_v39, %v162_v38 }
 0x134   :  { %v165_v41 = vrot.slane %v164_v40, 4 }
 0x136   :  { %v166_v42 = vadd.f32 %v165_v41, %v164_v40 }
 0x138   :  { %v167_v43 = vrot.slane %v166_v42, 2 }
 0x13a   :  { %v168_v44 = vadd.f32 %v167_v43, %v166_v42 }
 0x13c   :  { %v169_v45 = vrot.slane %v168_v44, 1 }
 0x13e   :  { %v170_v46 = vadd.f32 %v169_v45, %v168_v44 }
 0x140   :  { %172 = vst [vmem:[#allocation7 + $0x1] sm:$0x1] %v170_v46 }
 0x141   :  { %334 = shalt.err (!%p331_p6)
}
 0x142   :  { %s335_s10 = scalar_lea.hbm %s409_s2, 32 }
 0x143   :  { %p336_p7 = scmp.ne.s32.totalorder %s409_s2, %s335_s10  ;;  %p339_p8 = scmp.lt.u32.totalorder %s335_s10, %s409_s2 }
 0x145   :  { %p341_p9 = pnand %p339_p8, %p336_p7 }
 0x147   :  { %344 = shalt.err (!%p341_p9)
}
 0x148   :  { %182 = dma.vmem_to_hbm [thread:$0]  %s180_s6, 32, %s409_s2, [#allocation4]  }
 0x149   :  { %349 = dma.done.wait [#allocation4], 32  }
 0x14a   :  { %350 = vsyncadd [#allocation4], 4294967264 }
 0x14b   :  { %186 = vsyncpa [#allocation3], 1 }
 0x14c   :  { %187 = vsyncpa [#allocation6], 1 }
 0x14d   :  { %188 = vsyncpa [#allocation4], 1 }

</bundles_post_ra>
